<compile_context>
chip_gen: v7x
topology: tpu7x:2x2x1
jax: 0.10.0
libtpu: 0.0.40
codegen_flags: <defaults>
</compile_context>

<pallas_src>
import functools

import jax
import jax.numpy as jnp
from jax.experimental import pallas as pl
from jax.experimental.pallas import tpu as pltpu

BN_EPS = 1e-5


def _conv_bn_relu_kernel(x_ref, w_ref, gamma_ref, beta_ref, o_ref,
                         xsum_ref, gram_ref, scale_ref, shift_ref,
                         *, m_total, bblk):
    # x_ref: (Bblk, Cin, T)   w_ref: (Cout, Cin)   gamma/beta: (Cout, 1) f32
    # o_ref: (Bblk, Cout, T)
    # scratch: xsum (Cin,1) f32, gram (Cin,Cin) f32, scale/shift (Cout,1) f32
    phase = pl.program_id(0)
    n = pl.program_id(1)
    t = pl.program_id(2)
    is_first = (n == 0) & (t == 0)

    @pl.when(phase == 0)
    def _accumulate_stats():
        # Pure streaming pass over x: only Cin-sized statistics are produced.
        @pl.when(is_first)
        def _init():
            xsum_ref[...] = jnp.zeros_like(xsum_ref)
            gram_ref[...] = jnp.zeros_like(gram_ref)

        for b in range(bblk):  # static unroll over the batch block
            xb = x_ref[b]                                          # (Cin, T)
            xsum_ref[...] += jnp.sum(xb.astype(jnp.float32),
                                     axis=1, keepdims=True)
            # G += x x^T : contraction dim = T (>=128), uses the MXU well.
            gram_ref[...] += jax.lax.dot_general(
                xb, xb, (((1,), (1,)), ((), ())),
                preferred_element_type=jnp.float32)                # (Cin, Cin)

    @pl.when(phase == 1)
    def _normalize():
        @pl.when(is_first)
        def _finalize_stats():
            w = w_ref[...].astype(jnp.float32)                     # (Cout, Cin)
            inv_m = 1.0 / m_total
            mean = jnp.dot(w, xsum_ref[...],
                           preferred_element_type=jnp.float32) * inv_m  # (Cout,1)
            wg = jnp.dot(w, gram_ref[...],
                         preferred_element_type=jnp.float32)       # (Cout, Cin)
            ey2 = jnp.sum(wg * w, axis=1, keepdims=True) * inv_m   # (Cout, 1)
            # Clamp: E[y^2]-mean^2 can go slightly negative in f32.
            var = jnp.maximum(ey2 - mean * mean, 0.0)
            scale = gamma_ref[...] * jax.lax.rsqrt(var + BN_EPS)
            scale_ref[...] = scale
            shift_ref[...] = beta_ref[...] - mean * scale

        scale = scale_ref[...]
        shift = shift_ref[...]
        for b in range(bblk):
            # 1x1 conv == pointwise matmul, lane-dense on the spatial tile.
            y = jnp.dot(w_ref[...], x_ref[b],
                        preferred_element_type=jnp.float32)        # (Cout, T)
            o_ref[b] = jnp.maximum(y * scale + shift, 0.0).astype(o_ref.dtype)


def _round_up(a, b):
    return (a + b - 1) // b * b


def _largest_divisor_tile(hw_pad, max_lanes):
    """Largest multiple of 128 that divides hw_pad and is <= max_lanes."""
    best = 128
    t = 128
    limit = min(hw_pad, max(128, max_lanes))
    while t <= limit:
        if hw_pad % t == 0:
            best = t
        t += 128
    return best


def _largest_divisor_leq(n, cap):
    cap = max(1, min(n, cap))
    for b in range(cap, 0, -1):
        if n % b == 0:
            return b
    return 1


def conv_bn_relu(x_nchw, weight_oihw, gamma, beta, *,
                 vmem_budget_bytes=40 * 1024 * 1024):
    """Forward of ConvBnrelu2d_1 (kernel_size=1, stride=1, pad=0, no conv bias)."""
    N, Cin, H, W = x_nchw.shape
    Cout = weight_oihw.shape[0]
    HW = H * W
    M = N * HW                      # true element count per channel (no pad)
    HW_pad = _round_up(HW, 128)     # lane-dense tiles; pad is zero-filled

    x_bytes = jnp.dtype(x_nchw.dtype).itemsize
    out_bytes = x_bytes
    # VMEM per spatial lane of one grid step:
    #   2x double-buffered x block + 2x double-buffered out block
    #   + f32 (Cout, T) matmul result in phase 1.
    per_lane = 2 * Cin * x_bytes + 2 * Cout * out_bytes + Cout * 4
    fixed = (2 * Cout * Cin * 4                     # W (double-buffered)
             + (Cin + Cin * Cin + 4 * Cout) * 4     # stats scratch + gamma/beta
             + (1 << 20))                           # compiler headroom
    max_lanes = max(128, (vmem_budget_bytes - fixed) // per_lane)
    max_lanes = min((max_lanes // 128) * 128, 2048)  # >2048 shows no roofline gain

    tile_hw = _largest_divisor_tile(HW_pad, max_lanes)
    num_t = HW_pad // tile_hw
    # Small-spatial layers: fold several images per grid step to amortize the
    # per-step pipeline overhead (~0.35us).
    bblk = 1
    if num_t == 1 and tile_hw < max_lanes:
        bblk = _largest_divisor_leq(N, max_lanes // tile_hw)

    # Pure reshapes (no transposes): NCHW -> (N, Cin, HW[, pad]); W -> (Cout, Cin).
    x3d = x_nchw.reshape(N, Cin, HW)
    if HW_pad != HW:
        x3d = jnp.pad(x3d, ((0, 0), (0, 0), (0, HW_pad - HW)))
    w2d = weight_oihw.reshape(Cout, Cin)
    gamma2d = gamma.reshape(Cout, 1).astype(jnp.float32)
    beta2d = beta.reshape(Cout, 1).astype(jnp.float32)

    kernel = functools.partial(_conv_bn_relu_kernel,
                               m_total=float(M), bblk=bblk)

    vmem_limit = int(min(48 * 1024 * 1024,
                         max(32 * 1024 * 1024,
                             fixed + per_lane * bblk * tile_hw + (8 << 20))))

    out3d = pl.pallas_call(
        kernel,
        out_shape=jax.ShapeDtypeStruct((N, Cout, HW_pad), x_nchw.dtype),
        grid_spec=pltpu.PrefetchScalarGridSpec(
            num_scalar_prefetch=0,
            grid=(2, N // bblk, num_t),  # (phase, batch blocks, spatial tiles)
            in_specs=[
                pl.BlockSpec((bblk, Cin, tile_hw), lambda p, n, t: (n, 0, t)),
                pl.BlockSpec((Cout, Cin), lambda p, n, t: (0, 0)),
                pl.BlockSpec((Cout, 1), lambda p, n, t: (0, 0)),
                pl.BlockSpec((Cout, 1), lambda p, n, t: (0, 0)),
            ],
            # Phase 0 never writes the output: park the block index at (0,0,0)
            # so nothing is flushed until phase 1 rewrites each block.  Even if
            # Pallas ever flushed on every step, only block (0,0,0) would see a
            # transient garbage value and the first phase-1 step rewrites it,
            # so the final result stays correct under revisit-semantics changes.
            out_specs=pl.BlockSpec((bblk, Cout, tile_hw),
                                   lambda p, n, t: (p * n, 0, p * t)),
            scratch_shapes=[
                pltpu.VMEM((Cin, 1), jnp.float32),      # xsum = sum_t x
                pltpu.VMEM((Cin, Cin), jnp.float32),    # G    = sum_t x x^T
                pltpu.VMEM((Cout, 1), jnp.float32),     # scale = gamma*rsqrt(var+eps)
                pltpu.VMEM((Cout, 1), jnp.float32),     # shift = beta - mean*scale
            ],
        ),
        compiler_params=pltpu.CompilerParams(
            # Sequential on purpose: BN stats are accumulated across the whole
            # grid in per-core scratch, so no axis may be megacore-sharded.
            dimension_semantics=("arbitrary", "arbitrary", "arbitrary"),
            vmem_limit_bytes=vmem_limit,
        ),
    )(x3d, w2d, gamma2d, beta2d)

    if HW_pad != HW:
        out3d = out3d[:, :, :HW]
    return out3d.reshape(N, Cout, H, W)


def init_params(key, in_channels, out_channels):
    # Conv2d weight, xavier_uniform init (fan_in = Cin, fan_out = Cout for 1x1).
    bound = (6.0 / (in_channels + out_channels)) ** 0.5
    weight = jax.random.uniform(
        key, (out_channels, in_channels, 1, 1),
        minval=-bound, maxval=bound, dtype=jnp.float32)
    # BatchNorm2d: weight (gamma) filled with 1, bias (beta) zeroed.
    gamma = jnp.ones((out_channels,), jnp.float32)
    beta = jnp.zeros((out_channels,), jnp.float32)
    return weight, gamma, beta


if __name__ == "__main__":
    key = jax.random.PRNGKey(0)
    k_x, k_w = jax.random.split(key)

    N, Cin, Hs, Ws = 2, 4, 16, 16
    Cout = 8

    x = jax.random.normal(k_x, (N, Cin, Hs, Ws), dtype=jnp.float32)
    weight, gamma, beta = init_params(k_w, Cin, Cout)

    out = conv_bn_relu(x, weight, gamma, beta)
    jax.block_until_ready(out)

    # Pure-JAX reference (conv1x1 + training-mode BN + relu).
    y_ref = jnp.einsum("nchw,oc->nohw", x, weight.reshape(Cout, Cin))
    mean = y_ref.mean(axis=(0, 2, 3), keepdims=True)
    var = ((y_ref - mean) ** 2).mean(axis=(0, 2, 3), keepdims=True)
    ref = jnp.maximum(
        (y_ref - mean) * jax.lax.rsqrt(var + BN_EPS)
        * gamma.reshape(1, Cout, 1, 1) + beta.reshape(1, Cout, 1, 1),
        0.0)

    assert out.shape == (N, Cout, Hs, Ws)
    assert jnp.allclose(out, ref, atol=1e-4, rtol=1e-4), (
        float(jnp.max(jnp.abs(out - ref))))

    print("KERNEL_OK")
</pallas_src>

<mosaic_0001>
module attributes {stable_mosaic.version = 11 : i64} {
  func.func @_conv_bn_relu_kernel(%arg0: i32, %arg1: i32, %arg2: i32, %arg3: memref<2x4x256xf32, #tpu.memory_space<vmem>>, %arg4: memref<8x4xf32, #tpu.memory_space<vmem>>, %arg5: memref<8x1xf32, #tpu.memory_space<vmem>>, %arg6: memref<8x1xf32, #tpu.memory_space<vmem>>, %arg7: memref<2x8x256xf32, #tpu.memory_space<vmem>>, %arg8: memref<4x1xf32, #tpu.memory_space<vmem>>, %arg9: memref<4x4xf32, #tpu.memory_space<vmem>>, %arg10: memref<8x1xf32, #tpu.memory_space<vmem>>, %arg11: memref<8x1xf32, #tpu.memory_space<vmem>>) attributes {dimension_semantics = [#tpu.dimension_semantics<arbitrary>, #tpu.dimension_semantics<arbitrary>, #tpu.dimension_semantics<arbitrary>], iteration_bounds = array<i64: 2, 1, 1>, scalar_prefetch = 0 : i64, scratch_operands = 4 : i64, tpu.core_type = #tpu.core_type<tc>, window_params = [{transform_indices = @transform_0, window_bounds = array<i64: 2, 4, 256>}, {pipeline_mode = #tpu.pipeline_mode<synchronous>, transform_indices = @transform_1, window_bounds = array<i64: 8, 4>}, {pipeline_mode = #tpu.pipeline_mode<synchronous>, transform_indices = @transform_2, window_bounds = array<i64: 8, 1>}, {pipeline_mode = #tpu.pipeline_mode<synchronous>, transform_indices = @transform_3, window_bounds = array<i64: 8, 1>}, {transform_indices = @transform_4, window_bounds = array<i64: 2, 8, 256>}]} {
    %c0_i32 = arith.constant 0 : i32
    %0 = arith.cmpi eq, %arg1, %c0_i32 : i32
    %c0_i32_0 = arith.constant 0 : i32
    %1 = arith.cmpi eq, %arg2, %c0_i32_0 : i32
    %2 = arith.andi %0, %1 : i1
    %c0_i32_1 = arith.constant 0 : i32
    %3 = arith.cmpi eq, %arg0, %c0_i32_1 : i32
    %4 = arith.extui %3 : i1 to i32
    %c0_i32_2 = arith.constant 0 : i32
    %5 = arith.cmpi ne, %4, %c0_i32_2 : i32
    scf.if %5 {
      %9 = arith.extui %2 : i1 to i32
      %c0_i32_4 = arith.constant 0 : i32
      %10 = arith.cmpi ne, %9, %c0_i32_4 : i32
      scf.if %10 {
        %cst_28 = arith.constant 0.000000e+00 : f32
        %33 = vector.broadcast %cst_28 : f32 to vector<4x1xf32>
        %c0_29 = arith.constant 0 : index
        %c0_30 = arith.constant 0 : index
        %34 = vector.load %arg8[%c0_29, %c0_30] : memref<4x1xf32, #tpu.memory_space<vmem>>, vector<4x1xf32>
        tpu.vector_store %arg8[%c0_29, %c0_30], %33 {strides = array<i32>} : memref<4x1xf32, #tpu.memory_space<vmem>>, vector<4x1xf32>,
        %cst_31 = arith.constant 0.000000e+00 : f32
        %35 = vector.broadcast %cst_31 : f32 to vector<4x4xf32>
        %c0_32 = arith.constant 0 : index
        %c0_33 = arith.constant 0 : index
        %36 = vector.load %arg9[%c0_32, %c0_33] : memref<4x4xf32, #tpu.memory_space<vmem>>, vector<4x4xf32>
        tpu.vector_store %arg9[%c0_32, %c0_33], %35 {strides = array<i32>} : memref<4x4xf32, #tpu.memory_space<vmem>>, vector<4x4xf32>,
      } else {
      }
      %c0 = arith.constant 0 : index
      %c0_5 = arith.constant 0 : index
      %c0_6 = arith.constant 0 : index
      %11 = vector.load %arg3[%c0, %c0_5, %c0_6] : memref<2x4x256xf32, #tpu.memory_space<vmem>>, vector<1x4x256xf32>
      %12 = vector.shape_cast %11 : vector<1x4x256xf32> to vector<4x256xf32>
      %c0_7 = arith.constant 0 : index
      %c0_8 = arith.constant 0 : index
      %13 = vector.load %arg8[%c0_7, %c0_8] : memref<4x1xf32, #tpu.memory_space<vmem>>, vector<4x1xf32>
      %cst = arith.constant dense<0.000000e+00> : vector<4xf32>
      %14 = vector.multi_reduction <add>, %12, %cst [1] : vector<4x256xf32> to vector<4xf32>
      %15 = vector.shape_cast %14 : vector<4xf32> to vector<4x1xf32>
      %16 = arith.addf %13, %15 : vector<4x1xf32>
      %c0_9 = arith.constant 0 : index
      %c0_10 = arith.constant 0 : index
      %17 = vector.load %arg8[%c0_9, %c0_10] : memref<4x1xf32, #tpu.memory_space<vmem>>, vector<4x1xf32>
      tpu.vector_store %arg8[%c0_9, %c0_10], %16 {strides = array<i32>} : memref<4x1xf32, #tpu.memory_space<vmem>>, vector<4x1xf32>,
      %c0_11 = arith.constant 0 : index
      %c0_12 = arith.constant 0 : index
      %18 = vector.load %arg9[%c0_11, %c0_12] : memref<4x4xf32, #tpu.memory_space<vmem>>, vector<4x4xf32>
      %cst_13 = arith.constant dense<0.000000e+00> : vector<4x4xf32>
      %19 = tpu.matmul %12, %12, %cst_13 {dimension_numbers = #tpu.dot_dimension_numbers<[1], [1], [0], [0], [0, 0, 1, 0], [], []>} : vector<4x256xf32>, vector<4x256xf32>, vector<4x4xf32> -> vector<4x4xf32>
      %20 = arith.addf %18, %19 : vector<4x4xf32>
      %c0_14 = arith.constant 0 : index
      %c0_15 = arith.constant 0 : index
      %21 = vector.load %arg9[%c0_14, %c0_15] : memref<4x4xf32, #tpu.memory_space<vmem>>, vector<4x4xf32>
      tpu.vector_store %arg9[%c0_14, %c0_15], %20 {strides = array<i32>} : memref<4x4xf32, #tpu.memory_space<vmem>>, vector<4x4xf32>,
      %c1 = arith.constant 1 : index
      %c0_16 = arith.constant 0 : index
      %c0_17 = arith.constant 0 : index
      %22 = vector.load %arg3[%c1, %c0_16, %c0_17] : memref<2x4x256xf32, #tpu.memory_space<vmem>>, vector<1x4x256xf32>
      %23 = vector.shape_cast %22 : vector<1x4x256xf32> to vector<4x256xf32>
      %c0_18 = arith.constant 0 : index
      %c0_19 = arith.constant 0 : index
      %24 = vector.load %arg8[%c0_18, %c0_19] : memref<4x1xf32, #tpu.memory_space<vmem>>, vector<4x1xf32>
      %cst_20 = arith.constant dense<0.000000e+00> : vector<4xf32>
      %25 = vector.multi_reduction <add>, %23, %cst_20 [1] : vector<4x256xf32> to vector<4xf32>
      %26 = vector.shape_cast %25 : vector<4xf32> to vector<4x1xf32>
      %27 = arith.addf %24, %26 : vector<4x1xf32>
      %c0_21 = arith.constant 0 : index
      %c0_22 = arith.constant 0 : index
      %28 = vector.load %arg8[%c0_21, %c0_22] : memref<4x1xf32, #tpu.memory_space<vmem>>, vector<4x1xf32>
      tpu.vector_store %arg8[%c0_21, %c0_22], %27 {strides = array<i32>} : memref<4x1xf32, #tpu.memory_space<vmem>>, vector<4x1xf32>,
      %c0_23 = arith.constant 0 : index
      %c0_24 = arith.constant 0 : index
      %29 = vector.load %arg9[%c0_23, %c0_24] : memref<4x4xf32, #tpu.memory_space<vmem>>, vector<4x4xf32>
      %cst_25 = arith.constant dense<0.000000e+00> : vector<4x4xf32>
      %30 = tpu.matmul %23, %23, %cst_25 {dimension_numbers = #tpu.dot_dimension_numbers<[1], [1], [0], [0], [0, 0, 1, 0], [], []>} : vector<4x256xf32>, vector<4x256xf32>, vector<4x4xf32> -> vector<4x4xf32>
      %31 = arith.addf %29, %30 : vector<4x4xf32>
      %c0_26 = arith.constant 0 : index
      %c0_27 = arith.constant 0 : index
      %32 = vector.load %arg9[%c0_26, %c0_27] : memref<4x4xf32, #tpu.memory_space<vmem>>, vector<4x4xf32>
      tpu.vector_store %arg9[%c0_26, %c0_27], %31 {strides = array<i32>} : memref<4x4xf32, #tpu.memory_space<vmem>>, vector<4x4xf32>,
    } else {
    }
    %c1_i32 = arith.constant 1 : i32
    %6 = arith.cmpi eq, %arg0, %c1_i32 : i32
    %7 = arith.extui %6 : i1 to i32
    %c0_i32_3 = arith.constant 0 : i32
    %8 = arith.cmpi ne, %7, %c0_i32_3 : i32
    scf.if %8 {
      %9 = arith.extui %2 : i1 to i32
      %c0_i32_4 = arith.constant 0 : i32
      %10 = arith.cmpi ne, %9, %c0_i32_4 : i32
      scf.if %10 {
        %c0_26 = arith.constant 0 : index
        %c0_27 = arith.constant 0 : index
        %39 = vector.load %arg4[%c0_26, %c0_27] : memref<8x4xf32, #tpu.memory_space<vmem>>, vector<8x4xf32>
        %c0_28 = arith.constant 0 : index
        %c0_29 = arith.constant 0 : index
        %40 = vector.load %arg8[%c0_28, %c0_29] : memref<4x1xf32, #tpu.memory_space<vmem>>, vector<4x1xf32>
        %cst_30 = arith.constant dense<0.000000e+00> : vector<8x1xf32>
        %41 = tpu.matmul %39, %40, %cst_30 {dimension_numbers = #tpu.dot_dimension_numbers<[1], [0], [0], [1], [0, 0, 1, 1], [], []>} : vector<8x4xf32>, vector<4x1xf32>, vector<8x1xf32> -> vector<8x1xf32>
        %cst_31 = arith.constant 0.001953125 : f32
        %42 = vector.broadcast %cst_31 : f32 to vector<8x1xf32>
        %43 = arith.mulf %41, %42 : vector<8x1xf32>
        %c0_32 = arith.constant 0 : index
        %c0_33 = arith.constant 0 : index
        %44 = vector.load %arg9[%c0_32, %c0_33] : memref<4x4xf32, #tpu.memory_space<vmem>>, vector<4x4xf32>
        %cst_34 = arith.constant dense<0.000000e+00> : vector<8x4xf32>
        %45 = tpu.matmul %39, %44, %cst_34 {dimension_numbers = #tpu.dot_dimension_numbers<[1], [0], [0], [1], [0, 0, 1, 1], [], []>} : vector<8x4xf32>, vector<4x4xf32>, vector<8x4xf32> -> vector<8x4xf32>
        %46 = arith.mulf %45, %39 : vector<8x4xf32>
        %cst_35 = arith.constant dense<0.000000e+00> : vector<8xf32>
        %47 = vector.multi_reduction <add>, %46, %cst_35 [1] : vector<8x4xf32> to vector<8xf32>
        %48 = vector.shape_cast %47 : vector<8xf32> to vector<8x1xf32>
        %cst_36 = arith.constant 0.001953125 : f32
        %49 = vector.broadcast %cst_36 : f32 to vector<8x1xf32>
        %50 = arith.mulf %48, %49 : vector<8x1xf32>
        %51 = arith.mulf %43, %43 : vector<8x1xf32>
        %52 = arith.subf %50, %51 : vector<8x1xf32>
        %cst_37 = arith.constant 0.000000e+00 : f32
        %53 = vector.broadcast %cst_37 : f32 to vector<8x1xf32>
        %54 = arith.maximumf %52, %53 : vector<8x1xf32>
        %c0_38 = arith.constant 0 : index
        %c0_39 = arith.constant 0 : index
        %55 = vector.load %arg5[%c0_38, %c0_39] : memref<8x1xf32, #tpu.memory_space<vmem>>, vector<8x1xf32>
        %cst_40 = arith.constant 9.99999974E-6 : f32
        %56 = vector.broadcast %cst_40 : f32 to vector<8x1xf32>
        %57 = arith.addf %54, %56 : vector<8x1xf32>
        %58 = math.rsqrt %57 : vector<8x1xf32>
        %59 = arith.mulf %55, %58 : vector<8x1xf32>
        %c0_41 = arith.constant 0 : index
        %c0_42 = arith.constant 0 : index
        %60 = vector.load %arg10[%c0_41, %c0_42] : memref<8x1xf32, #tpu.memory_space<vmem>>, vector<8x1xf32>
        tpu.vector_store %arg10[%c0_41, %c0_42], %59 {strides = array<i32>} : memref<8x1xf32, #tpu.memory_space<vmem>>, vector<8x1xf32>,
        %c0_43 = arith.constant 0 : index
        %c0_44 = arith.constant 0 : index
        %61 = vector.load %arg6[%c0_43, %c0_44] : memref<8x1xf32, #tpu.memory_space<vmem>>, vector<8x1xf32>
        %62 = arith.mulf %43, %59 : vector<8x1xf32>
        %63 = arith.subf %61, %62 : vector<8x1xf32>
        %c0_45 = arith.constant 0 : index
        %c0_46 = arith.constant 0 : index
        %64 = vector.load %arg11[%c0_45, %c0_46] : memref<8x1xf32, #tpu.memory_space<vmem>>, vector<8x1xf32>
        tpu.vector_store %arg11[%c0_45, %c0_46], %63 {strides = array<i32>} : memref<8x1xf32, #tpu.memory_space<vmem>>, vector<8x1xf32>,
      } else {
      }
      %c0 = arith.constant 0 : index
      %c0_5 = arith.constant 0 : index
      %11 = vector.load %arg10[%c0, %c0_5] : memref<8x1xf32, #tpu.memory_space<vmem>>, vector<8x1xf32>
      %c0_6 = arith.constant 0 : index
      %c0_7 = arith.constant 0 : index
      %12 = vector.load %arg11[%c0_6, %c0_7] : memref<8x1xf32, #tpu.memory_space<vmem>>, vector<8x1xf32>
      %c0_8 = arith.constant 0 : index
      %c0_9 = arith.constant 0 : index
      %13 = vector.load %arg4[%c0_8, %c0_9] : memref<8x4xf32, #tpu.memory_space<vmem>>, vector<8x4xf32>
      %c0_10 = arith.constant 0 : index
      %c0_11 = arith.constant 0 : index
      %c0_12 = arith.constant 0 : index
      %14 = vector.load %arg3[%c0_10, %c0_11, %c0_12] : memref<2x4x256xf32, #tpu.memory_space<vmem>>, vector<1x4x256xf32>
      %15 = vector.shape_cast %14 : vector<1x4x256xf32> to vector<4x256xf32>
      %cst = arith.constant dense<0.000000e+00> : vector<8x256xf32>
      %16 = tpu.matmul %13, %15, %cst {dimension_numbers = #tpu.dot_dimension_numbers<[1], [0], [0], [1], [0, 0, 1, 1], [], []>} : vector<8x4xf32>, vector<4x256xf32>, vector<8x256xf32> -> vector<8x256xf32>
      %17 = vector.broadcast %11 : vector<8x1xf32> to vector<8x256xf32>
      %18 = arith.mulf %16, %17 : vector<8x256xf32>
      %19 = vector.broadcast %12 : vector<8x1xf32> to vector<8x256xf32>
      %20 = arith.addf %18, %19 : vector<8x256xf32>
      %cst_13 = arith.constant 0.000000e+00 : f32
      %21 = vector.broadcast %cst_13 : f32 to vector<8x256xf32>
      %22 = arith.maximumf %20, %21 : vector<8x256xf32>
      %c0_14 = arith.constant 0 : index
      %c0_15 = arith.constant 0 : index
      %c0_16 = arith.constant 0 : index
      %23 = vector.load %arg7[%c0_14, %c0_15, %c0_16] : memref<2x8x256xf32, #tpu.memory_space<vmem>>, vector<1x8x256xf32>
      %24 = vector.shape_cast %23 : vector<1x8x256xf32> to vector<8x256xf32>
      %25 = vector.shape_cast %22 : vector<8x256xf32> to vector<1x8x256xf32>
      tpu.vector_store %arg7[%c0_14, %c0_15, %c0_16], %25 {strides = array<i32>} : memref<2x8x256xf32, #tpu.memory_space<vmem>>, vector<1x8x256xf32>,
      %c0_17 = arith.constant 0 : index
      %c0_18 = arith.constant 0 : index
      %26 = vector.load %arg4[%c0_17, %c0_18] : memref<8x4xf32, #tpu.memory_space<vmem>>, vector<8x4xf32>
      %c1 = arith.constant 1 : index
      %c0_19 = arith.constant 0 : index
      %c0_20 = arith.constant 0 : index
      %27 = vector.load %arg3[%c1, %c0_19, %c0_20] : memref<2x4x256xf32, #tpu.memory_space<vmem>>, vector<1x4x256xf32>
      %28 = vector.shape_cast %27 : vector<1x4x256xf32> to vector<4x256xf32>
      %cst_21 = arith.constant dense<0.000000e+00> : vector<8x256xf32>
      %29 = tpu.matmul %26, %28, %cst_21 {dimension_numbers = #tpu.dot_dimension_numbers<[1], [0], [0], [1], [0, 0, 1, 1], [], []>} : vector<8x4xf32>, vector<4x256xf32>, vector<8x256xf32> -> vector<8x256xf32>
      %30 = vector.broadcast %11 : vector<8x1xf32> to vector<8x256xf32>
      %31 = arith.mulf %29, %30 : vector<8x256xf32>
      %32 = vector.broadcast %12 : vector<8x1xf32> to vector<8x256xf32>
      %33 = arith.addf %31, %32 : vector<8x256xf32>
      %cst_22 = arith.constant 0.000000e+00 : f32
      %34 = vector.broadcast %cst_22 : f32 to vector<8x256xf32>
      %35 = arith.maximumf %33, %34 : vector<8x256xf32>
      %c1_23 = arith.constant 1 : index
      %c0_24 = arith.constant 0 : index
      %c0_25 = arith.constant 0 : index
      %36 = vector.load %arg7[%c1_23, %c0_24, %c0_25] : memref<2x8x256xf32, #tpu.memory_space<vmem>>, vector<1x8x256xf32>
      %37 = vector.shape_cast %36 : vector<1x8x256xf32> to vector<8x256xf32>
      %38 = vector.shape_cast %35 : vector<8x256xf32> to vector<1x8x256xf32>
      tpu.vector_store %arg7[%c1_23, %c0_24, %c0_25], %38 {strides = array<i32>} : memref<2x8x256xf32, #tpu.memory_space<vmem>>, vector<1x8x256xf32>,
    } else {
    }
    return
  }
  func.func @transform_0(%arg0: i32, %arg1: i32, %arg2: i32) -> (i32, i32, i32) {
    %c0_i32 = arith.constant 0 : i32
    %c0_i32_0 = arith.constant 0 : i32
    return %arg1, %c0_i32, %arg2 : i32, i32, i32
  }
  func.func @transform_1(%arg0: i32, %arg1: i32, %arg2: i32) -> (i32, i32) {
    %c0_i32 = arith.constant 0 : i32
    %c0_i32_0 = arith.constant 0 : i32
    %c0_i32_1 = arith.constant 0 : i32
    return %c0_i32, %c0_i32_0 : i32, i32
  }
  func.func @transform_2(%arg0: i32, %arg1: i32, %arg2: i32) -> (i32, i32) {
    %c0_i32 = arith.constant 0 : i32
    %c0_i32_0 = arith.constant 0 : i32
    %c0_i32_1 = arith.constant 0 : i32
    return %c0_i32, %c0_i32_0 : i32, i32
  }
  func.func @transform_3(%arg0: i32, %arg1: i32, %arg2: i32) -> (i32, i32) {
    %c0_i32 = arith.constant 0 : i32
    %c0_i32_0 = arith.constant 0 : i32
    %c0_i32_1 = arith.constant 0 : i32
    return %c0_i32, %c0_i32_0 : i32, i32
  }
  func.func @transform_4(%arg0: i32, %arg1: i32, %arg2: i32) -> (i32, i32, i32) {
    %0 = arith.muli %arg0, %arg1 : i32
    %1 = arith.muli %arg0, %arg2 : i32
    %c0_i32 = arith.constant 0 : i32
    %c0_i32_0 = arith.constant 0 : i32
    return %0, %c0_i32, %1 : i32, i32, i32
  }
}

</mosaic_0001>

<bundles_post_ra>
// kernel: tpu_custom_call.1
= control target key start
LH: loop header
LB: loop body
LE: loop exit
PB: predicated region body
PF: predicated region fallthrough
CT: control target
= control target key end

     0   :  { %9 = vsyncpa [#allocation7], 0  ;;  %s1183_s0 = inlined_call_operand.vmem [shape: f32[2,4,256], index: 0, kind: input, shape index: {}]   ;;  %s1184_s1 = inlined_call_operand.vmem [shape: f32[8,4], index: 1, kind: input, shape index: {}]   ;;  %s1185_s2 = inlined_call_operand.vmem [shape: f32[8,1], index: 2, kind: input, shape index: {}]   ;;  %s1186_s3 = inlined_call_operand.vmem [shape: f32[8,1], index: 3, kind: input, shape index: {}]   ;;  %s1187_s4 = inlined_call_operand.hbm [shape: f32[2,8,256], index: 4, kind: output, shape index: {}]  }
   0x1   :  { %11 = vsyncpa [#allocation7 + $0x1], 0  ;;  %s1088_s15 = smov 0   ;;  %s1090_s16 = smov 0  }
   0x2   :  { %s1092_s17 = smov 0  }
   0x3 LB: > { %s913_s18 = sadd.s32 4294967295, %s1054_s17   ;;  %s914_s19 = sadd.s32 4294967294, %s1054_s17   ;;  %s1054_s17 = sphi %s1092_s17, %s17_s17   ;;  %s1050_s16 = sphi %s1090_s16, %s1190_s16   ;;  %s1046_s15 = sphi %s1088_s15, %s1189_s15  }
   0x4   : > { %s36_s20 = sadd.s32 1, %s1050_s16  ;;  %p917_p0 = scmp.ge.s32.totalorder %s1054_s17, 1 }
   0x5   : > { %p38_p1 = scmp.ge.s32.totalorder %s36_s20, 2  ;;  %p199_p2 = scmp.lt.s32.totalorder %s1054_s17, 3 }
   0x7   : > { %s1192_s20 = smov (%p38_p1, %s36_s20), 0  ;;  %p200_p3 = pnand %p917_p0, %p199_p2 }
   0x8   : > { %p918_p4 = scmp.ne.s32.totalorder (!%p200_p3), %s1046_s15, 0 }
   0x9   : > { %203 = sbr.rel (%p200_p3) target bundleno = 804 (0x324), region = 36 }
  0x10   : > { %253 = sbr.rel (%p918_p4) target bundleno = 248 (0xf8), region = 40  ;;  %v260_v0 = vld [vmem:[%s1183_s0] sm:$0xff] (!%p918_p4)  ;;  %v919_v1 = vld [vmem:[%s1183_s0 + $0x8] sm:$0xff] (!%p918_p4)  ;;  %vm265_vm0 = vcmask (!%p918_p4), 1043456   ;;  %vm258_vm1 = vcmask (!%p918_p4), 27648   ;;  %v1056_v5 = vmov (!%p918_p4), 0.0  }
  0x11   : > { %v263_v2 = vcombine.high (!%p918_p4), %v260_v0, %v260_v0  ;;  %v352_v3 = vcombine.high (!%p918_p4), %v919_v1, %v919_v1  ;;  %v266_v4 = vsel (!%p918_p4), %vm265_vm0, %v260_v0, 0.0  ;;  %259 = vst.msk [vmem:[#allocation3] sm:$0xf] (!%p918_p4), %vm258_vm1, %v1056_v5  ;;  %v354_v7 = vsel (!%p918_p4), %vm265_vm0, %v919_v1, 0.0 }
  0x12   : > { %vm256_vm2 = vcmask (!%p918_p4), 3072  }
  0x13   : > { %275 = vmatprep.subr.mxu0 (!%p918_p4), %v263_v2  ;;  %339 = vmatprep.mubr.f32.mxu0 (!%p918_p4), %v263_v2  ;;  %v267_v6 = vsel (!%p918_p4), %vm265_vm0, %v263_v2, 0.0  ;;  %v355_v8 = vsel (!%p918_p4), %vm265_vm0, %v352_v3, 0.0  ;;  %257 = vst.msk [vmem:[#allocation2] sm:$0xf] (!%p918_p4), %vm256_vm2, %v1056_v5 }
  0x14   : > { %276 = vmatpush1.xpose.msra.mxu0 (!%p918_p4), %v260_v0  ;;  %362 = vmatprep.subr.mxu1 (!%p918_p4), %v352_v3  ;;  %v268_v9 = vadd.f32 (!%p918_p4), %v267_v6, %v266_v4  ;;  %v356_v10 = vadd.f32 (!%p918_p4), %v355_v8, %v354_v7 }
  0x15   : > { %363 = vmatpush1.xpose.msra.mxu1 (!%p918_p4), %v919_v1  ;;  %426 = vmatprep.mubr.f32.mxu1 (!%p918_p4), %v352_v3 }
  0x16   : > { %269 = vadd.xlane.f32.xlu0 (!%p918_p4), %v268_v9 }
  0x17   : > { %340 = vmatmul.mubr.f32.vlgmr.msra.gmra.mrb[0].mxu0 %v260_v0 }
  0x18   : > { %427 = vmatmul.mubr.f32.vlgmr.msra.gmra.mrb[0].mxu1 %v919_v1  ;;  %v274_v17 = vld [vmem:[#allocation3] sm:$0xf] }
  0x1a   : > { %357 = vadd.xlane.f32.xlu0 %v356_v10  ;;  %v261_v11 = vld [vmem:[#allocation2] sm:$0xf] }
  0xa3   : > { %v270_v12 = vpop.xlane.xlu0 %269 }
  0xa4   : > { %v271_v13 = vadd.f32 %v270_v12, %v261_v11 }
  0xa6   : > { %273 = vst.msk [vmem:[#allocation2] sm:$0xf] %vm256_vm2, %v271_v13 }
  0xa7   : > { %v358_v14 = vpop.xlane.xlu0 %357 }
  0xad   : > { %v350_v15 = vld [vmem:[#allocation2] sm:$0xf] }
  0xae   : > { %v359_v16 = vadd.f32 %v358_v14, %v350_v15 }
  0xb0   : > { %360 = vst.msk [vmem:[#allocation2] sm:$0xf] %vm256_vm2, %v359_v16 }
  0xea   : > { %v341_v18 = vpop.f32.mrb[0].mxu0 }
  0xeb   : > { %v345_v19 = vadd.f32 %v341_v18, %v274_v17  ;;  %v343_v20 = vpop.f32.mrb[1].mxu0  ;;  %v428_v21 = vpop.f32.mrb[0].mxu1 }
  0xec   : > { %v430_v22 = vpop.f32.mrb[1].mxu1 }
  0xed   : > { %347 = vst.msk [vmem:[#allocation3] sm:$0xf] %vm258_vm1, %v345_v19 }
  0xf4   : > { %v361_v23 = vld [vmem:[#allocation3] sm:$0xf] }
  0xf5   : > { %v432_v24 = vadd.f32 %v428_v21, %v361_v23 }
  0xf7   : > { %433 = vst.msk [vmem:[#allocation3] sm:$0xf] %vm258_vm1, %v432_v24 }
  0xf8 PF: > { %p920_p5 = scmp.ne.s32.totalorder %s1046_s15, 1 }
  0xf9   : > { %vm446_vm3 = vcmask (!%p920_p5), 1043456   ;;  %v440_v26 = vld [vmem:[%s1184_s1] sm:$0xff] (!%p920_p5)  ;;  %v1057_v27 = vmov (!%p920_p5), 0.0   ;;  %vm1058_vm4 = vmmov (!%p920_p5), 0   ;;  %vm442_vm5 = vcmask (!%p920_p5), 31744   ;;  %v928_v30 = vld [vmem:[%s1183_s0 + $0x8] sm:$0xff] (!%p920_p5) }
  0xfa   : > { %437 = sbr.rel (%p920_p5) target bundleno = 780 (0x30c), region = 48  ;;  %947 = vmatprep.subr.mxu1 (!%p920_p5), %v1057_v27  ;;  %949 = vmatprep.mubr.msk.f32.mxu1 (!%p920_p5), %vm1058_vm4, %v1057_v27  ;;  %v616_v29 = vld [vmem:[%s1183_s0] sm:$0xff] (!%p920_p5)  ;;  %v721_v32 = vcombine.high (!%p920_p5), %v928_v30, %v928_v30  ;;  %v1059_v39 = vmov (!%p920_p5), 0   ;;  %vm607_vm6 = vcmask (!%p920_p5), 7168  }
  0xfb   : > { %v441_v28 = vld [vmem:[#allocation2] sm:$0xf] (!%p920_p5)  ;;  %942 = vmatprep.subr.mxu0 (!%p920_p5), %v1057_v27  ;;  %944 = vmatprep.mubr.msk.f32.mxu0 (!%p920_p5), %vm1058_vm4, %v1057_v27  ;;  %v618_v31 = vcombine.high (!%p920_p5), %v616_v29, %v616_v29 }
  0xfc   : > { %943 = vmatpush3.msk.msra.mxu0 (!%p920_p5), %vm446_vm3, %v441_v28  ;;  %996 = vset.pattern.permute.xlu0 (!%p920_p5), %v1059_v39  ;;  %v603_v50 = vld [vmem:[%s1185_s2] sm:$0xff] (!%p920_p5) }
  0xfd   : > { %945 = vmatmul.mubr.msk.f32.vlgmr.msra.gmra.mrb[0].mxu0 (!%p920_p5), %vm442_vm5, %v440_v26  ;;  %925 = vmatprep.subr.msk.mxu0 (!%p920_p5), %vm446_vm3, %v618_v31  ;;  %v609_v53 = vld [vmem:[%s1186_s3] sm:$0xff] (!%p920_p5) }
  0xfe   : > { %v521_v25 = vld [vmem:[#allocation3] sm:$0xf] (!%p920_p5)  ;;  %692 = vmatprep.mubr.f32.mxu0 (!%p920_p5), %v1057_v27  ;;  %926 = vmatpush1.msk.msra.mxu0 (!%p920_p5), %vm446_vm3, %v616_v29 }
  0xff   : > { %948 = vmatpush3.msk.msra.mxu1 (!%p920_p5), %vm446_vm3, %v521_v25  ;;  %997 = vset.pattern.permute.xlu1 (!%p920_p5), %v1059_v39 }
 0x100   : > { %950 = vmatmul.mubr.msk.f32.vlgmr.msra.gmra.mrb[0].mxu1 (!%p920_p5), %vm442_vm5, %v440_v26  ;;  %929 = vmatprep.subr.msk.mxu1 (!%p920_p5), %vm446_vm3, %v721_v32 }
 0x101   : > { %793 = vmatprep.mubr.f32.mxu1 %v1057_v27  ;;  %930 = vmatpush1.msk.msra.mxu1 %vm446_vm3, %v928_v30 }
 0x102   : > { %927 = vmatmul.mubr.msk.f32.vlgmr.msra.gmra.mrb[2].mxu0 %vm442_vm5, %v440_v26 }
 0x104   : > { %931 = vmatmul.mubr.msk.f32.vlgmr.msra.gmra.mrb[2].mxu1 %vm442_vm5, %v440_v26 }
 0x1d0   : > { %v516_v36 = vpop.f32.mrb[0].mxu0 }
 0x1d1   : > { %v946_v38 = vpop.f32.mrb[1].mxu0  ;;  %v520_v43 = vmul.f32 0.001953125, %v516_v36 }
 0x1d3   : > { %v591_v33 = vpop.f32.mrb[0].mxu1  ;;  %v600_v44 = vmul.f32 %v520_v43, %v520_v43 }
 0x1d4   : > { %v595_v34 = vmul.f32 %v591_v33, %v440_v26  ;;  %v951_v35 = vpop.f32.mrb[1].mxu1 }
 0x1d5   : > { %v694_v40 = vpop.f32.mrb[2].mxu0 }
 0x1d6   : > { %v596_v37 = vsel %vm442_vm5, %v595_v34, 0.0  ;;  %v696_v57 = vpop.f32.mrb[3].mxu0 }
 0x1d7   : > { %597 = vadd.xlane.f32.xlu0 %v596_v37  ;;  %v795_v41 = vpop.f32.mrb[2].mxu1 }
 0x1d8   : > { %v797_v42 = vpop.f32.mrb[3].mxu1 }
 0x264   : > { %v598_v45 = vpop.xlane.xlu0 %597 }
 0x265   : > { %v599_v46 = vmul.f32 0.001953125, %v598_v45 }
 0x267   : > { %v601_v47 = vsub.f32 %v599_v46, %v600_v44 }
 0x269   : > { %v602_v48 = vmax.f32 %v601_v47, 0.0 }
 0x26b   : > { %v604_v49 = vadd.f32 1e-05, %v602_v48 }
 0x26d   : > { %1000 = vrsqrt.f32 %v604_v49 }
 0x277   : > { %v1001_v51 = vpop.eup %1000 }
 0x278   : > { %v606_v52 = vmul.f32 %v1001_v51, %v603_v50 }
 0x27a   : > { %608 = vst.msk [vmem:[#allocation4] sm:$0xff] %vm607_vm6, %v606_v52  ;;  %v610_v54 = vmul.f32 %v606_v52, %v520_v43 }
 0x27c   : > { %v611_v55 = vsub.f32 %v609_v53, %v610_v54 }
 0x27e   : > { %612 = vst.msk [vmem:[#allocation5] sm:$0xff] %vm607_vm6, %v611_v55 }
 0x281   : > { %v613_v56 = vld [vmem:[#allocation4] sm:$0xff] }
 0x282   : > { %701 = vperm.xlu0 %996, %v613_v56  }
 0x285   : > { %v614_v58 = vld [vmem:[#allocation5] sm:$0xff] }
 0x286   : > { %708 = vperm.xlu1 %997, %v614_v58  }
 0x301   : > { %v702_v59 = vpop.permute.xlu0 %701 }
 0x302   : > { %v704_v60 = vmul.f32 %v702_v59, %v694_v40  ;;  %v800_v61 = vmul.f32 %v795_v41, %v702_v59  ;;  %v801_v62 = vmul.f32 %v797_v42, %v702_v59  ;;  %v705_v63 = vmul.f32 %v702_v59, %v696_v57 }
 0x305   : > { %v709_v0 = vpop.permute.xlu1 %708 }
 0x306   : > { %v711_v1 = vadd.f32 %v709_v0, %v704_v60  ;;  %v712_v2 = vadd.f32 %v709_v0, %v705_v63  ;;  %v802_v3 = vadd.f32 %v800_v61, %v709_v0  ;;  %v803_v4 = vadd.f32 %v801_v62, %v709_v0 }
 0x308   : > { %v713_v5 = vmax.f32 %v711_v1, 0.0  ;;  %v714_v6 = vmax.f32 %v712_v2, 0.0  ;;  %v804_v7 = vmax.f32 %v802_v3, 0.0  ;;  %v805_v8 = vmax.f32 %v803_v4, 0.0 }
 0x30a   : > { %715 = vst [vmem:[#allocation6] sm:$0xff] %v713_v5  ;;  %716 = vst [vmem:[#allocation6 + $0x8] sm:$0xff] %v714_v6 }
 0x30b   : > { %932 = vst [vmem:[#allocation6 + $0x10] sm:$0xff] %v804_v7  ;;  %933 = vst [vmem:[#allocation6 + $0x18] sm:$0xff] %v805_v8 }
 0x30c PF: > { %p1149_p6 = scmp.eq.s32.totalorder %s913_s18, 1  ;;  %s1060_s10 = smov [#allocation6]  }
 0x30d   : > { %s828_s11 = sshll.u32 %s1060_s10, 4  ;;  %s829_s11 = int_to_ptr.vmem [resolvable:$true] %s828_s11 }
 0x30e   : > { %s1002_s12 = scalar_lea.vmem %s829_s11, 512  ;;  %s1008_s13 = scalar_lea.vmem %s829_s11, 1024 }
 0x30f   : > { %p1003_p7 = scmp.ne.s32.totalorder %s829_s11, %s1002_s12  ;;  %p1009_p10 = scmp.lt.s32.totalorder %s829_s11, %s829_s11 }
 0x310   : > { %p1010_p11 = scmp.lt.s32.totalorder %s1008_s13, %s1002_s12 }
 0x311   : > { %p1004_p8 = pnand %p1003_p7, %p1149_p6 }
 0x312   : > { %p1011_p12 = por %p1010_p11, %p1009_p10 }
 0x313   : > { %p1005_p9 = pneg %p1004_p8 }
 0x315   : > { %p1012_p13 = pnand %p1011_p12, %p1005_p9 }
 0x317   : > { %1015 = shalt.err (!%p1012_p13)
}
 0x318   : > { %s1016_s18 = scalar_lea.hbm %s1187_s4, 512 }
 0x319   : > { %p1017_p0 = scmp.ne.s32.totalorder %s1187_s4, %s1016_s18  ;;  %p1022_p3 = scmp.lt.u32.totalorder %s1016_s18, %s1187_s4 }
 0x31b   : > { %p1018_p1 = pnand %p1017_p0, %p1149_p6 }
 0x31d   : > { %p1019_p2 = pneg %p1018_p1 }
 0x31f   : > { %p1024_p4 = pnand %p1022_p3, %p1019_p2 }
 0x321   : > { %1027 = shalt.err (!%p1024_p4)
}
 0x322   : > { %s1061_s25 = smov 256   ;;  %s1062_s26 = smov 16  }
 0x323   : > { %953 = dma.vmem_to_hbm [thread:$0]  (%p1149_p6), %s829_s11, 512, %s1187_s4, [#allocation7], %s1061_s25, %s1061_s25, %s1062_s26  }
 0x324 PF: > { %p961_p5 = scmp.ge.s32.totalorder %s1054_s17, 2  ;;  %p962_p7 = scmp.eq.s32.totalorder %s914_s19, 1 }
 0x326   : > { %p957_p8 = pnand %p962_p7, %p961_p5 }
 0x328   : > { %1041 = dma.done.wait (!%p957_p8), [#allocation7], 512  }
 0x329   : > { %1043 = vsyncadd (!%p957_p8), [#allocation7], 4294966784  ;;  %s17_s17 = sadd.s32 1, %s1054_s17   ;;  %s1189_s15 = smov %s1050_s16 }
 0x32a   : > { %p14_p9 = scmp.ge.s32.totalorder %s17_s17, 4   ;;  %s1190_s16 = smov %s1192_s20 }
 0x32c   :  { %16 = sbr.rel (!%p14_p9) target bundleno = 3 (0x3), region = 90 }
 0x333   :  { %849 = vsyncpa [#allocation7], 1 }
 0x334   :  { %851 = vsyncpa [#allocation7 + $0x1], 1 }

</bundles_post_ra>
